<compile_context>
chip_gen: v7x
topology: tpu7x:2x2x1
jax: 0.10.0
libtpu: 0.0.40
codegen_flags: <defaults>
</compile_context>

<pallas_src>
import functools

import jax
import jax.numpy as jnp
from jax.experimental import pallas as pl
from jax.experimental.pallas import tpu as pltpu


# Keep each VMEM buffer at/below this (the output block is double-buffered).
_PER_BUFFER_VMEM_BUDGET = 4 * 1024 * 1024
# Small-table threshold for the VMEM-resident gather fast path.
_VMEM_TABLE_BYTES = 4 * 1024 * 1024
# Hard cap on rows per tile: the gather is descriptor-issue bound long before
# HBM bandwidth, and the issue loop is unrolled, so huge tiles don't help.
_MAX_TILE_M = 1024


def _embed_dma_kernel(tok_ref, w_hbm, out_ref, sem, *, tile_m: int):
    """General path: W_E in HBM, one async row copy per token.

    tok_ref: (n_pad,) int32 token ids, scalar-prefetched into SMEM (pre-clamped).
    w_hbm:   (V, D) embedding table, left in HBM (no auto-DMA).
    out_ref: (tile_m, D) VMEM output block for this grid step.
    sem:     single DMA semaphore shared by every row copy of the tile.
    """
    base = pl.program_id(0) * tile_m

    # Issue all row gathers concurrently, straight into the pipelined output
    # block; keep the descriptors so the waits reuse them.  Aggregated wait on
    # one semaphore: every row is the same byte count, so completion order
    # does not matter and after the last wait all rows have landed.
    copies = []
    for i in range(tile_m):
        tok = tok_ref[base + i]
        cp = pltpu.make_async_copy(
            w_hbm.at[pl.ds(tok, 1), :],
            out_ref.at[pl.ds(i, 1), :],
            sem,
        )
        cp.start()
        copies.append(cp)
    for cp in copies:
        cp.wait()


def _embed_vmem_kernel(tok_ref, w_ref, out_ref, *, tile_m: int):
    """Small-table fast path: W_E resident in VMEM, per-row vector loads."""
    base = pl.program_id(0) * tile_m
    for i in range(tile_m):
        tok = tok_ref[base + i]
        out_ref[pl.ds(i, 1), :] = w_ref[pl.ds(tok, 1), :]


def _choose_tile_m(n: int, d: int, itemsize: int, requested: int) -> int:
    # Minimum sublane tiling per dtype width (8 for f32, 16 for bf16, 32 for i8).
    min_rows = max(8, 32 // max(1, itemsize))
    # Rows that fit the per-buffer VMEM budget.
    budget_rows = max(min_rows, _PER_BUFFER_VMEM_BUDGET // max(1, d * itemsize))
    tm = max(min_rows, min(requested, budget_rows, _MAX_TILE_M))
    # Keep at least 2 grid steps when there is enough work so both v7x
    # TensorCores have tiles to issue DMAs for.
    if n >= 2 * min_rows:
        half = pl.cdiv(pl.cdiv(n, 2), min_rows) * min_rows
        tm = min(tm, half)
    tm = max(min_rows, (tm // min_rows) * min_rows)
    # Prefer a tile that divides n exactly (no tail padding, no post-kernel
    # slice copy), but only if it stays within 2x of the chosen tile.
    if n % tm != 0:
        cand = tm
        while cand >= max(min_rows, tm // 2):
            if n % cand == 0:
                return cand
            cand -= min_rows
    return tm


def embed_forward(
    tokens: jax.Array,
    w_e: jax.Array,
    *,
    tile_m: int = 256,
    force_dma: bool = False,
) -> jax.Array:
    """Pallas equivalent of `Embed.forward`: returns W_E[tokens], shape (B, P, D)."""
    B, P = tokens.shape
    V, D = w_e.shape
    n = B * P
    itemsize = jnp.dtype(w_e.dtype).itemsize

    tm = _choose_tile_m(n, D, itemsize, tile_m)
    n_pad = pl.cdiv(n, tm) * tm

    # Clamp once, vectorized, in the wrapper (keeps the in-kernel issue loop
    # to a bare SMEM load + descriptor push / vector load).
    # NOTE: out-of-range ids are clamped to [0, V-1]; PyTorch nn.Embedding
    # would raise instead.
    tok_flat = jnp.clip(tokens.reshape(n).astype(jnp.int32), 0, V - 1)
    if n_pad != n:
        tok_flat = jnp.pad(tok_flat, (0, n_pad - n))

    grid = (n_pad // tm,)
    out_shape = jax.ShapeDtypeStruct((n_pad, D), w_e.dtype)
    out_spec = pl.BlockSpec((tm, D), lambda m, tok: (m, 0))
    compiler_params = pltpu.CompilerParams(
        # The token-tile axis is fully independent -> shard across TCs on v7x.
        dimension_semantics=("parallel",),
    )

    use_vmem_table = (V * D * itemsize <= _VMEM_TABLE_BYTES) and not force_dma

    if use_vmem_table:
        out_flat = pl.pallas_call(
            functools.partial(_embed_vmem_kernel, tile_m=tm),
            out_shape=out_shape,
            grid_spec=pltpu.PrefetchScalarGridSpec(
                num_scalar_prefetch=1,                         # tokens -> SMEM
                grid=grid,
                # Whole table resident in VMEM; constant block index means it
                # is DMA'd from HBM exactly once across all grid steps.
                in_specs=[pl.BlockSpec((V, D), lambda m, tok: (0, 0))],
                out_specs=out_spec,
            ),
            compiler_params=compiler_params,
        )(tok_flat, w_e)
    else:
        out_flat = pl.pallas_call(
            functools.partial(_embed_dma_kernel, tile_m=tm),
            out_shape=out_shape,
            grid_spec=pltpu.PrefetchScalarGridSpec(
                num_scalar_prefetch=1,                         # tokens -> SMEM
                grid=grid,
                in_specs=[pl.BlockSpec(memory_space=pl.ANY)],  # W_E stays in HBM
                out_specs=out_spec,
                scratch_shapes=[pltpu.SemaphoreType.DMA(())],  # ONE shared sem
            ),
            compiler_params=compiler_params,
        )(tok_flat, w_e)

    if n_pad != n:
        out_flat = out_flat[:n]
    return out_flat.reshape(B, P, D)


if __name__ == "__main__":
    # Config-equivalent hyperparameters (small, deterministic).
    d_vocab = 64
    d_model = 32
    init_range = 0.02
    batch = 2
    position = 8

    key = jax.random.PRNGKey(0)
    k_w, k_tok, k_w2, k_tok2 = jax.random.split(key, 4)

    # nn.init.normal_(W_E, std=init_range)
    w_e = (init_range * jax.random.normal(k_w, (d_vocab, d_model))).astype(jnp.float32)
    tokens = jax.random.randint(k_tok, (batch, position), 0, d_vocab, dtype=jnp.int32)
    ref = w_e[tokens]

    # Small-table VMEM fast path (auto-dispatched for this config).
    out = jax.block_until_ready(embed_forward(tokens, w_e))
    assert out.shape == (batch, position, d_model)
    assert out.dtype == w_e.dtype
    assert jnp.array_equal(out, ref), "VMEM-path mismatch vs reference gather"

    # General HBM-DMA path on the same config (forced).
    out_dma = jax.block_until_ready(embed_forward(tokens, w_e, force_dma=True))
    assert jnp.array_equal(out_dma, ref), "DMA-path mismatch vs reference gather"

    # Lane-dense (D % 128 == 0) multi-tile check on both paths.
    V2, D2, B2, P2 = 512, 128, 2, 64
    w2 = (init_range * jax.random.normal(k_w2, (V2, D2))).astype(jnp.float32)
    t2 = jax.random.randint(k_tok2, (B2, P2), 0, V2, dtype=jnp.int32)
    ref2 = w2[t2]
    out2 = jax.block_until_ready(embed_forward(t2, w2))
    assert jnp.array_equal(out2, ref2), "VMEM-path mismatch (lane-dense config)"
    out2d = jax.block_until_ready(embed_forward(t2, w2, force_dma=True))
    assert jnp.array_equal(out2d, ref2), "DMA-path mismatch (lane-dense config)"

    print("KERNEL_OK")
</pallas_src>

<mosaic_0001>
module attributes {stable_mosaic.version = 11 : i64} {
  func.func @_embed_vmem_kernel(%arg0: i32, %arg1: memref<16xi32, #tpu.memory_space<smem>>, %arg2: memref<64x32xf32, #tpu.memory_space<vmem>>, %arg3: memref<8x32xf32, #tpu.memory_space<vmem>>) attributes {dimension_semantics = [#tpu.dimension_semantics<parallel>], iteration_bounds = array<i64: 2>, scalar_prefetch = 1 : i64, scratch_operands = 0 : i64, tpu.core_type = #tpu.core_type<tc>, window_params = [{pipeline_mode = #tpu.pipeline_mode<synchronous>, transform_indices = @transform_0, window_bounds = array<i64: 64, 32>}, {transform_indices = @transform_1, window_bounds = array<i64: 8, 32>}]} {
    %c8_i32 = arith.constant 8 : i32
    %0 = arith.muli %arg0, %c8_i32 : i32
    %c0_i32 = arith.constant 0 : i32
    %1 = arith.addi %0, %c0_i32 : i32
    %2 = arith.index_cast %1 : i32 to index
    %3 = memref.load %arg1[%2] : memref<16xi32, #tpu.memory_space<smem>>
    %4 = arith.index_cast %3 : i32 to index
    %c0 = arith.constant 0 : index
    %5 = vector.load %arg2[%4, %c0] : memref<64x32xf32, #tpu.memory_space<vmem>>, vector<1x32xf32>
    %c0_0 = arith.constant 0 : index
    %c0_1 = arith.constant 0 : index
    %6 = vector.load %arg3[%c0_0, %c0_1] : memref<8x32xf32, #tpu.memory_space<vmem>>, vector<1x32xf32>
    tpu.vector_store %arg3[%c0_0, %c0_1], %5 {strides = array<i32>} : memref<8x32xf32, #tpu.memory_space<vmem>>, vector<1x32xf32>,
    %c1_i32 = arith.constant 1 : i32
    %7 = arith.addi %0, %c1_i32 : i32
    %8 = arith.index_cast %7 : i32 to index
    %9 = memref.load %arg1[%8] : memref<16xi32, #tpu.memory_space<smem>>
    %10 = arith.index_cast %9 : i32 to index
    %c0_2 = arith.constant 0 : index
    %11 = vector.load %arg2[%10, %c0_2] : memref<64x32xf32, #tpu.memory_space<vmem>>, vector<1x32xf32>
    %c1 = arith.constant 1 : index
    %c0_3 = arith.constant 0 : index
    %12 = vector.load %arg3[%c1, %c0_3] : memref<8x32xf32, #tpu.memory_space<vmem>>, vector<1x32xf32>
    tpu.vector_store %arg3[%c1, %c0_3], %11 {strides = array<i32>} : memref<8x32xf32, #tpu.memory_space<vmem>>, vector<1x32xf32>,
    %c2_i32 = arith.constant 2 : i32
    %13 = arith.addi %0, %c2_i32 : i32
    %14 = arith.index_cast %13 : i32 to index
    %15 = memref.load %arg1[%14] : memref<16xi32, #tpu.memory_space<smem>>
    %16 = arith.index_cast %15 : i32 to index
    %c0_4 = arith.constant 0 : index
    %17 = vector.load %arg2[%16, %c0_4] : memref<64x32xf32, #tpu.memory_space<vmem>>, vector<1x32xf32>
    %c2 = arith.constant 2 : index
    %c0_5 = arith.constant 0 : index
    %18 = vector.load %arg3[%c2, %c0_5] : memref<8x32xf32, #tpu.memory_space<vmem>>, vector<1x32xf32>
    tpu.vector_store %arg3[%c2, %c0_5], %17 {strides = array<i32>} : memref<8x32xf32, #tpu.memory_space<vmem>>, vector<1x32xf32>,
    %c3_i32 = arith.constant 3 : i32
    %19 = arith.addi %0, %c3_i32 : i32
    %20 = arith.index_cast %19 : i32 to index
    %21 = memref.load %arg1[%20] : memref<16xi32, #tpu.memory_space<smem>>
    %22 = arith.index_cast %21 : i32 to index
    %c0_6 = arith.constant 0 : index
    %23 = vector.load %arg2[%22, %c0_6] : memref<64x32xf32, #tpu.memory_space<vmem>>, vector<1x32xf32>
    %c3 = arith.constant 3 : index
    %c0_7 = arith.constant 0 : index
    %24 = vector.load %arg3[%c3, %c0_7] : memref<8x32xf32, #tpu.memory_space<vmem>>, vector<1x32xf32>
    tpu.vector_store %arg3[%c3, %c0_7], %23 {strides = array<i32>} : memref<8x32xf32, #tpu.memory_space<vmem>>, vector<1x32xf32>,
    %c4_i32 = arith.constant 4 : i32
    %25 = arith.addi %0, %c4_i32 : i32
    %26 = arith.index_cast %25 : i32 to index
    %27 = memref.load %arg1[%26] : memref<16xi32, #tpu.memory_space<smem>>
    %28 = arith.index_cast %27 : i32 to index
    %c0_8 = arith.constant 0 : index
    %29 = vector.load %arg2[%28, %c0_8] : memref<64x32xf32, #tpu.memory_space<vmem>>, vector<1x32xf32>
    %c4 = arith.constant 4 : index
    %c0_9 = arith.constant 0 : index
    %30 = vector.load %arg3[%c4, %c0_9] : memref<8x32xf32, #tpu.memory_space<vmem>>, vector<1x32xf32>
    tpu.vector_store %arg3[%c4, %c0_9], %29 {strides = array<i32>} : memref<8x32xf32, #tpu.memory_space<vmem>>, vector<1x32xf32>,
    %c5_i32 = arith.constant 5 : i32
    %31 = arith.addi %0, %c5_i32 : i32
    %32 = arith.index_cast %31 : i32 to index
    %33 = memref.load %arg1[%32] : memref<16xi32, #tpu.memory_space<smem>>
    %34 = arith.index_cast %33 : i32 to index
    %c0_10 = arith.constant 0 : index
    %35 = vector.load %arg2[%34, %c0_10] : memref<64x32xf32, #tpu.memory_space<vmem>>, vector<1x32xf32>
    %c5 = arith.constant 5 : index
    %c0_11 = arith.constant 0 : index
    %36 = vector.load %arg3[%c5, %c0_11] : memref<8x32xf32, #tpu.memory_space<vmem>>, vector<1x32xf32>
    tpu.vector_store %arg3[%c5, %c0_11], %35 {strides = array<i32>} : memref<8x32xf32, #tpu.memory_space<vmem>>, vector<1x32xf32>,
    %c6_i32 = arith.constant 6 : i32
    %37 = arith.addi %0, %c6_i32 : i32
    %38 = arith.index_cast %37 : i32 to index
    %39 = memref.load %arg1[%38] : memref<16xi32, #tpu.memory_space<smem>>
    %40 = arith.index_cast %39 : i32 to index
    %c0_12 = arith.constant 0 : index
    %41 = vector.load %arg2[%40, %c0_12] : memref<64x32xf32, #tpu.memory_space<vmem>>, vector<1x32xf32>
    %c6 = arith.constant 6 : index
    %c0_13 = arith.constant 0 : index
    %42 = vector.load %arg3[%c6, %c0_13] : memref<8x32xf32, #tpu.memory_space<vmem>>, vector<1x32xf32>
    tpu.vector_store %arg3[%c6, %c0_13], %41 {strides = array<i32>} : memref<8x32xf32, #tpu.memory_space<vmem>>, vector<1x32xf32>,
    %c7_i32 = arith.constant 7 : i32
    %43 = arith.addi %0, %c7_i32 : i32
    %44 = arith.index_cast %43 : i32 to index
    %45 = memref.load %arg1[%44] : memref<16xi32, #tpu.memory_space<smem>>
    %46 = arith.index_cast %45 : i32 to index
    %c0_14 = arith.constant 0 : index
    %47 = vector.load %arg2[%46, %c0_14] : memref<64x32xf32, #tpu.memory_space<vmem>>, vector<1x32xf32>
    %c7 = arith.constant 7 : index
    %c0_15 = arith.constant 0 : index
    %48 = vector.load %arg3[%c7, %c0_15] : memref<8x32xf32, #tpu.memory_space<vmem>>, vector<1x32xf32>
    tpu.vector_store %arg3[%c7, %c0_15], %47 {strides = array<i32>} : memref<8x32xf32, #tpu.memory_space<vmem>>, vector<1x32xf32>,
    return
  }
  func.func @transform_0(%arg0: i32, %arg1: memref<16xi32, #tpu.memory_space<smem>>) -> (i32, i32) {
    %c0_i32 = arith.constant 0 : i32
    %c0_i32_0 = arith.constant 0 : i32
    %c0_i32_1 = arith.constant 0 : i32
    return %c0_i32, %c0_i32_0 : i32, i32
  }
  func.func @transform_1(%arg0: i32, %arg1: memref<16xi32, #tpu.memory_space<smem>>) -> (i32, i32) {
    %c0_i32 = arith.constant 0 : i32
    %c0_i32_0 = arith.constant 0 : i32
    return %arg0, %c0_i32 : i32, i32
  }
}

</mosaic_0001>

<bundles_post_ra>
// kernel: tpu_custom_call.1
= control target key start
LH: loop header
LB: loop body
LE: loop exit
PB: predicated region body
PF: predicated region fallthrough
CT: control target
= control target key end

     0   :  { %s491_s0 = inlined_call_operand.vmem [shape: s32[16], index: 0, kind: input, shape index: {}]   ;;  %s492_s1 = inlined_call_operand.vmem [shape: f32[64,32], index: 1, kind: input, shape index: {}]   ;;  %s493_s2 = inlined_call_operand.hbm [shape: f32[16,32], index: 2, kind: output, shape index: {}]  }
   0x1   :  { %s7_s11 = sshll.u32 %s491_s0, 4  ;;  %s8_s11 = int_to_ptr.vmem [resolvable:$true] %s7_s11 }
   0x2   :  { %s261_s12 = scalar_lea.vmem %s8_s11, 16  ;;  %p266_p1 = scmp.lt.s32.totalorder %s8_s11, %s8_s11 }
   0x3   :  { %p262_p0 = scmp.ne.s32.totalorder %s8_s11, %s261_s12  ;;  %p267_p2 = scmp.lt.s32.totalorder %s261_s12, %s261_s12 }
   0x5   :  { %p268_p3 = por %p267_p2, %p266_p1 }
   0x7   :  { %p269_p4 = pnand %p268_p3, %p262_p0 }
   0x9   :  { %272 = shalt.err (!%p269_p4)  }
   0xa   :  { %s339_s13 = smov [#allocation3]  }
   0xb   :  { %10 = dma.vmem_to_smem %s8_s11, 16, %s339_s13, [#allocation2] }
   0xc   :  { %317 = dma.done.wait [#allocation2], 16 }
   0xd   :  { %318 = vsyncadd [#allocation2], 4294967280 }
   0xe   :  { %12 = sfence }
   0xf   :  { %13 = vsyncpa [#allocation5], 0 }
  0x10   :  { %15 = vsyncpa [#allocation5 + $0x1], 0  ;;  %s359_s14 = smov 0   ;;  %s361_s15 = smov 0  }
  0x11   :  { %s363_s0 = smov 0   ;;  %s365_s16 = smov 0  }
  0x12 LB: > { %496 = sst [smem:[#allocation8_spill]] %s333_s0  ;;  %s380_s17 = sadd.s32 4294967295, %s337_s16   ;;  %s337_s16 = sphi %s365_s16, %s505_s16   ;;  %s333_s0 = sphi %s363_s0, %s502_s0   ;;  %s329_s15 = sphi %s361_s15, %s504_s15   ;;  %s325_s14 = sphi %s359_s14, %s503_s14  }
  0x13   : > { %s212_s18 = sadd.s32 4294967294, %s337_s16   ;;  %s384_s19 = sadd.s32 1, %s337_s16  }
  0x14   : > { %s49_s20 = sadd.s32 1, %s333_s0  ;;  %s46_s21 = ssub.s32 %s337_s16, %s384_s19 }
  0x15   : > { %p59_p5 = scmp.ne.s32.totalorder %s333_s0, %s329_s15  ;;  %p47_p6 = scmp.eq.s32.totalorder %s46_s21, 0 }
  0x16   : > { %p60_p7 = scmp.eq.s32.totalorder %s380_s17, 1  ;;  %p65_p8 = scmp.ne.s32.totalorder %s329_s15, %s325_s14 }
  0x17   : > { %p66_p9 = scmp.eq.s32.totalorder %s212_s18, 1  ;;  %p214_p12 = scmp.ge.s32.totalorder %s337_s16, 1 }
  0x18   : > { %s395_s22 = scalar_select %p47_p6, %s333_s0, %s49_s20  }
  0x19   : > { %p397_p10 = por %p60_p7, %p59_p5  ;;  %p401_p11 = por %p66_p9, %p65_p8 }
  0x1a   : > { %497 = sst [smem:[#allocation9_spill]] %s395_s22  ;;  %p87_p13 = scmp.lt.s32.totalorder %s337_s16, 3 }
  0x1c   : > { %p88_p0 = pnand %p214_p12, %p87_p13 }
  0x1d   : > { %s494_s25 = sand.u32 (!%p88_p0), 1, %s329_s15   ;;  %s216_s26 = sshll.u32 (!%p88_p0), %s380_s17, 3  ;;  %vm106_vm0 = vcmask (!%p88_p0), 253952  }
  0x1e   : > { %91 = sbr.rel (%p88_p0) target bundleno = 68 (0x44), region = 24  ;;  %s215_s27 = sshll.u32 (!%p88_p0), %s494_s25, 3 }
  0x1f   : > { %s103_s28 = sld [smem:[#allocation3 + %s216_s26]] (!%p88_p0)  ;;  %s108_s29 = sadd.s32 (!%p88_p0), 1, %s216_s26 }
  0x20   : > { %s113_s30 = sadd.s32 (!%p88_p0), 2, %s216_s26  ;;  %s109_s3 = sld [smem:[#allocation3 + %s108_s29]] (!%p88_p0) }
  0x21   : > { %s114_s4 = sld [smem:[#allocation3 + %s113_s30]] (!%p88_p0)  ;;  %s118_s5 = sadd.s32 (!%p88_p0), 3, %s216_s26 }
  0x22   : > { %s123_s6 = sadd.s32 (!%p88_p0), 4, %s216_s26  ;;  %s119_s7 = sld [smem:[#allocation3 + %s118_s5]] (!%p88_p0) }
  0x23   : > { %s124_s8 = sld [smem:[#allocation3 + %s123_s6]] (!%p88_p0)  ;;  %s128_s12 = sadd.s32 (!%p88_p0), 5, %s216_s26 }
  0x24   : > { %s129_s13 = sld [smem:[#allocation3 + %s128_s12]] (!%p88_p0)  ;;  %s133_s18 = sadd.s32 (!%p88_p0), 6, %s216_s26 }
  0x25   : > { %s104_s11 = scalar_lea.vmem %s492_s1, %s103_s28  ;;  %s101_s20 = scalar_lea.vmem [#allocation4], %s215_s27 }
  0x26   : > { %v105_v0 = vld [vmem:[%s104_s11] sm:$0x1]  ;;  %s134_s21 = sld [smem:[#allocation3 + %s133_s18]]  ;;  %s138_s29 = sadd.s32 7, %s216_s26 }
  0x27   : > { %107 = vst.msk [vmem:[%s101_s20] sm:$0x1] %vm106_vm0, %v105_v0  ;;  %s110_s22 = scalar_lea.vmem %s492_s1, %s109_s3  ;;  %s115_s0 = scalar_lea.vmem %s492_s1, %s114_s4 }
  0x28   : > { %v111_v1 = vld [vmem:[%s110_s22] sm:$0x1]  ;;  %s139_s28 = sld [smem:[#allocation3 + %s138_s29]]  ;;  %s120_s10 = scalar_lea.vmem %s492_s1, %s119_s7 }
  0x29   : > { %v116_v2 = vld [vmem:[%s115_s0] sm:$0x1]  ;;  %112 = vst.msk [vmem:[%s101_s20 + $0x1] sm:$0x1] %vm106_vm0, %v111_v1  ;;  %s125_s25 = scalar_lea.vmem %s492_s1, %s124_s8  ;;  %s218_s3 = sshll.u32 %s380_s17, 7 }
  0x2a   : > { %117 = vst.msk [vmem:[%s101_s20 + $0x2] sm:$0x1] %vm106_vm0, %v116_v2  ;;  %v121_v3 = vld [vmem:[%s120_s10] sm:$0x1]  ;;  %s130_s4 = scalar_lea.vmem %s492_s1, %s129_s13  ;;  %s157_s12 = sshll.u32 %s101_s20, 4  ;;  %s448_s12 = int_to_ptr.vmem [resolvable:$true] %s157_s12 }
  0x2b   : > { %v126_v4 = vld [vmem:[%s125_s25] sm:$0x1]  ;;  %122 = vst.msk [vmem:[%s101_s20 + $0x3] sm:$0x1] %vm106_vm0, %v121_v3  ;;  %s442_s30 = scalar_lea.hbm %s493_s2, %s218_s3  ;;  %s273_s9 = scalar_lea.vmem %s448_s12, 128 }
  0x2c   : > { %127 = vst.msk [vmem:[%s101_s20 + $0x4] sm:$0x1] %vm106_vm0, %v126_v4  ;;  %v131_v5 = vld [vmem:[%s130_s4] sm:$0x1]  ;;  %s135_s29 = scalar_lea.vmem %s492_s1, %s134_s21  ;;  %s500_s21 = sand.u32 1, %s329_s15  }
  0x2d   : > { %132 = vst.msk [vmem:[%s101_s20 + $0x5] sm:$0x1] %vm106_vm0, %v131_v5  ;;  %v136_v6 = vld [vmem:[%s135_s29] sm:$0x1]  ;;  %s144_s27 = scalar_lea.sflag [#allocation5], %s500_s21  ;;  %p274_p1 = scmp.ne.s32.totalorder %s448_s12, %s273_s9 }
  0x2e   : > { %137 = vst.msk [vmem:[%s101_s20 + $0x6] sm:$0x1] %vm106_vm0, %v136_v6  ;;  %s140_s13 = scalar_lea.vmem %s492_s1, %s139_s28  ;;  %s340_s10 = smov [#allocation4]  }
  0x2f   : > { %v141_v7 = vld [vmem:[%s140_s13] sm:$0x1]  ;;  %p275_p2 = pnand %p274_p1, %p397_p10  ;;  %s277_s26 = sshll.u32 %s340_s10, 4  ;;  %s278_s26 = int_to_ptr.vmem [resolvable:$false] %s277_s26 }
  0x30   : > { %142 = vst.msk [vmem:[%s101_s20 + $0x7] sm:$0x1] %vm106_vm0, %v141_v7  ;;  %s279_s11 = scalar_lea.vmem %s278_s26, 256  ;;  %p280_p4 = scmp.lt.s32.totalorder %s448_s12, %s278_s26 }
  0x31   : > { %p276_p3 = pneg %p275_p2  ;;  %p281_p5 = scmp.lt.s32.totalorder %s279_s11, %s273_s9 }
  0x33   : > { %p282_p6 = por %p281_p5, %p280_p4 }
  0x35   : > { %p283_p7 = pnand %p282_p6, %p276_p3 }
  0x37   : > { %286 = shalt.err (!%p283_p7)
}
  0x38   : > { %s287_s20 = scalar_lea.hbm %s442_s30, 128  ;;  %s291_s3 = scalar_lea.hbm %s493_s2, 256 }
  0x39   : > { %p288_p8 = scmp.ne.s32.totalorder %s442_s30, %s287_s20  ;;  %p292_p13 = scmp.lt.u32.totalorder %s442_s30, %s493_s2 }
  0x3a   : > { %p293_p0 = scmp.lt.u32.totalorder %s291_s3, %s287_s20  ;;  %p295_p2 = scmp.lt.u32.totalorder %s287_s20, %s442_s30 }
  0x3b   : > { %p289_p9 = pnand %p288_p8, %p397_p10 }
  0x3c   : > { %p294_p1 = por %p293_p0, %p292_p13 }
  0x3d   : > { %p290_p12 = pneg %p289_p9 }
  0x3e   : > { %p296_p3 = por %p295_p2, %p294_p1 }
  0x40   : > { %p297_p4 = pnand %p296_p3, %p290_p12 }
  0x42   : > { %300 = shalt.err (!%p297_p4)
}
  0x43   : > { %221 = dma.vmem_to_hbm [thread:$0]  (%p397_p10), %s448_s12, 128, %s442_s30, %s144_s27  }
  0x44 PF: > { %p227_p5 = scmp.ge.s32.totalorder %s337_s16, 2  ;;  %s169_s4 = sand.u32 1, %s325_s14  }
  0x45   : > { %s170_s7 = scalar_lea.sflag [#allocation5], %s169_s4 }
  0x46   : > { %p224_p6 = pnand %p227_p5, %p401_p11 }
  0x48   : > { %320 = dma.done.wait (!%p224_p6), %s170_s7, 128  }
  0x49   : > { %322 = vsyncadd (!%p224_p6), %s170_s7, 4294967168  ;;  %s501_s18 = sld [smem:[#allocation8_spill]]  ;;  %s502_s0 = sld [smem:[#allocation9_spill]] }
  0x4a   : > { %p18_p7 = scmp.ge.s32.totalorder %s384_s19, 4   ;;  %s503_s14 = smov %s329_s15 }
  0x4b   : > { %s505_s16 = smov %s384_s19 }
  0x4c   :  { %20 = sbr.rel (!%p18_p7) target bundleno = 18 (0x12), region = 64 }
  0x4f   : > { %s504_s15 = smov %s501_s18 }
  0x53   :  { %175 = vsyncpa [#allocation5], 1 }
  0x54   :  { %177 = vsyncpa [#allocation5 + $0x1], 1 }

</bundles_post_ra>
